<compile_context>
chip_gen: v6e
topology: v6e:2x2x1
jax: 0.10.0
libtpu: 0.0.40
codegen_flags: <defaults>
</compile_context>

<pallas_src>
import functools

import jax
import jax.numpy as jnp
from jax.experimental import pallas as pl
from jax.experimental.pallas import tpu as pltpu


def mlp_kernel(x_ref, w1_ref, b1_ref, w2_ref, b2_ref, w3_ref, b3_ref, o_ref):
    # x arrives f32 and unpadded; cast to bf16 in-kernel (VPU filler hidden under the MXU).
    x = x_ref[...].astype(jnp.bfloat16)

    # linear1 -> (dropout, p=0 identity) -> relu   (bias-add / relu in f32)
    h1 = jnp.dot(x, w1_ref[...], preferred_element_type=jnp.float32) + b1_ref[...]
    h1 = jnp.maximum(h1, 0.0)

    # linear2 -> (dropout, p=0 identity) -> relu
    h2 = jnp.dot(h1.astype(jnp.bfloat16), w2_ref[...],
                 preferred_element_type=jnp.float32) + b2_ref[...]
    h2 = jnp.maximum(h2, 0.0)

    # linear3 (no activation); unpadded (tb, out_size) f32 store
    out = jnp.dot(h2.astype(jnp.bfloat16), w3_ref[...],
                  preferred_element_type=jnp.float32) + b3_ref[...]
    o_ref[...] = out.astype(o_ref.dtype)


def _round_up(n, m):
    return ((n + m - 1) // m) * m


def _pad_to(a, shape):
    pads = [(0, s - d) for d, s in zip(a.shape, shape)]
    return jnp.pad(a, pads)


def prepare_params(params):
    """One-time weight prep: pad ONLY the hidden dim to a lane multiple and cast the
    weights to bf16 (biases stay f32, 2-D). Padding with zeros is exact: padded hidden
    columns stay 0 through bias-add/ReLU and contribute 0 to downstream dots."""
    w1, b1, w2, b2, w3, b3 = (params[k] for k in ("w1", "b1", "w2", "b2", "w3", "b3"))
    in_size, H = w1.shape
    out_size = w3.shape[1]
    h_p = _round_up(H, 128)
    return {
        "w1": _pad_to(w1, (in_size, h_p)).astype(jnp.bfloat16),
        "b1": _pad_to(b1, (1, h_p)).astype(jnp.float32),
        "w2": _pad_to(w2, (h_p, h_p)).astype(jnp.bfloat16),
        "b2": _pad_to(b2, (1, h_p)).astype(jnp.float32),
        "w3": _pad_to(w3, (h_p, out_size)).astype(jnp.bfloat16),
        "b3": b3.astype(jnp.float32),
    }


def _choose_tb(B, tb_target):
    """Batch tile: multiple of 8 (sublanes); prefer >=2 grid steps (v7x has 2 TCs);
    align to 256 (MXU-friendly on v6e/v7x) or 16 (bf16 sublane packing) when possible."""
    B8 = _round_up(max(B, 1), 8)
    if B8 <= 32:                       # tiny batch: a single small tile
        return B8
    tb = min(tb_target, _round_up(pl.cdiv(B8, 2), 8))
    if tb >= 256:
        tb = (tb // 256) * 256
    elif tb >= 16:
        tb = (tb // 16) * 16
    return max(tb, 8)


def net_forward(x, prepared, *, tb=512):
    """x: [batch, in_size] float32 (unpadded). prepared: output of prepare_params()."""
    w1, b1, w2, b2, w3, b3 = (prepared[k] for k in ("w1", "b1", "w2", "b2", "w3", "b3"))
    B, in_size = x.shape
    h_p = w1.shape[1]
    out_size = w3.shape[1]

    tb = _choose_tb(B, tb)
    B_p = _round_up(B, tb)
    x_in = x if B_p == B else jnp.pad(x, ((0, B_p - B), (0, 0)))  # batch-only pad (cheap)

    grid = (B_p // tb,)

    # VMEM budget: single-buffered resident weights + double-buffered x/out tiles
    # + headroom for the f32 h1/h2 intermediates. Generation-aware ceiling (~90% of VMEM).
    resident_bytes = sum(int(a.size) * a.dtype.itemsize for a in (w1, b1, w2, b2, w3, b3))
    io_tile_bytes = tb * in_size * 4 + tb * out_size * 4
    interm_bytes = 4 * tb * h_p * 4
    vmem_need = resident_bytes + 2 * io_tile_bytes + interm_bytes + (2 << 20)
    try:
        vmem_cap = int(pltpu.get_tpu_info().vmem_capacity_bytes)
    except Exception:
        vmem_cap = 64 << 20            # conservative fallback (v7x per-TC VMEM)
    vmem_limit = int(min(max(vmem_need, 8 << 20), int(vmem_cap * 0.9)))

    flops = 2 * B_p * (in_size * h_p + h_p * h_p + h_p * out_size)
    bytes_accessed = B_p * in_size * 4 + resident_bytes + B_p * out_size * 4

    def resident_spec(shape):
        # Grid-invariant operand: constant block index, single VMEM buffer.
        return pl.BlockSpec(shape, lambda i: (0, 0), pipeline_mode=pl.Buffered(1))

    out = pl.pallas_call(
        mlp_kernel,
        out_shape=jax.ShapeDtypeStruct((B_p, out_size), jnp.float32),
        grid=grid,
        in_specs=[
            pl.BlockSpec((tb, in_size), lambda i: (i, 0)),   # x: batch-tiled, f32, unpadded
            resident_spec((in_size, h_p)),                   # w1 (bf16, resident)
            resident_spec((1, h_p)),                         # b1 (f32, resident)
            resident_spec((h_p, h_p)),                       # w2 (bf16, resident)
            resident_spec((1, h_p)),                         # b2 (f32, resident)
            resident_spec((h_p, out_size)),                  # w3 (bf16, resident)
            resident_spec((1, out_size)),                    # b3 (f32, resident)
        ],
        out_specs=pl.BlockSpec((tb, out_size), lambda i: (i, 0)),
        compiler_params=pltpu.CompilerParams(
            dimension_semantics=("parallel",),
            vmem_limit_bytes=vmem_limit,
        ),
        cost_estimate=pl.CostEstimate(
            flops=flops, transcendentals=0, bytes_accessed=bytes_accessed),
    )(x_in, w1, b1, w2, b2, w3, b3)

    return out if B_p == B else out[:B]


def init_params(key, in_size, n_hidden, out_size):
    """Deterministic init mimicking nn.Linear's uniform(-1/sqrt(fan_in), +1/sqrt(fan_in)).
    Weights are stored as [in, out] (transposed vs PyTorch's [out, in])."""
    ks = jax.random.split(key, 6)

    def linear(kw, kb, fan_in, fan_out):
        bound = 1.0 / jnp.sqrt(jnp.float32(fan_in))
        w = jax.random.uniform(kw, (fan_in, fan_out), jnp.float32, -bound, bound)
        b = jax.random.uniform(kb, (1, fan_out), jnp.float32, -bound, bound)
        return w, b

    w1, b1 = linear(ks[0], ks[1], in_size, n_hidden)
    w2, b2 = linear(ks[2], ks[3], n_hidden, n_hidden)
    w3, b3 = linear(ks[4], ks[5], n_hidden, out_size)
    return {"w1": w1, "b1": b1, "w2": w2, "b2": b2, "w3": w3, "b3": b3}


def net_forward_ref_bf16(x, params):
    """Pure-JAX reference mirroring the kernel's bf16 MXU inputs / f32 accumulation."""
    def dot_bf16(a, w):
        return jnp.dot(a.astype(jnp.bfloat16), w.astype(jnp.bfloat16),
                       preferred_element_type=jnp.float32)
    h1 = jnp.maximum(dot_bf16(x, params["w1"]) + params["b1"], 0.0)
    h2 = jnp.maximum(dot_bf16(h1, params["w2"]) + params["b2"], 0.0)
    return dot_bf16(h2, params["w3"]) + params["b3"]


def net_forward_ref_f32(x, params):
    h1 = jnp.maximum(x @ params["w1"] + params["b1"], 0.0)
    h2 = jnp.maximum(h1 @ params["w2"] + params["b2"], 0.0)
    return h2 @ params["w3"] + params["b3"]


if __name__ == "__main__":
    batch, in_size, n_hidden, out_size = 8, 16, 32, 4

    key = jax.random.PRNGKey(0)
    k_x, k_p = jax.random.split(key)

    x = jax.random.normal(k_x, (batch, in_size), jnp.float32)
    params = init_params(k_p, in_size, n_hidden, out_size)

    prepared = prepare_params(params)          # one-time pad + bf16 cast of the weights
    fwd = jax.jit(functools.partial(net_forward, tb=512))

    out = jax.block_until_ready(fwd(x, prepared))
    assert out.shape == (batch, out_size)

    # Tight check against a reference using the same bf16-input / f32-accumulate dots.
    ref_bf16 = net_forward_ref_bf16(x, params)
    assert jnp.allclose(out, ref_bf16, atol=1e-4, rtol=1e-4)

    # Loose sanity check against the pure-f32 reference (bf16 cast ~0.4% rel error).
    ref_f32 = net_forward_ref_f32(x, params)
    assert jnp.allclose(out, ref_f32, atol=5e-2, rtol=5e-2)

    print("KERNEL_OK")
</pallas_src>

<mosaic_0001>
module attributes {stable_mosaic.version = 11 : i64} {
  func.func @mlp_kernel(%arg0: i32, %arg1: memref<8x16xf32, #tpu.memory_space<vmem>>, %arg2: memref<16x128xbf16, #tpu.memory_space<vmem>>, %arg3: memref<1x128xf32, #tpu.memory_space<vmem>>, %arg4: memref<128x128xbf16, #tpu.memory_space<vmem>>, %arg5: memref<1x128xf32, #tpu.memory_space<vmem>>, %arg6: memref<128x4xbf16, #tpu.memory_space<vmem>>, %arg7: memref<1x4xf32, #tpu.memory_space<vmem>>, %arg8: memref<8x4xf32, #tpu.memory_space<vmem>>) attributes {dimension_semantics = [#tpu.dimension_semantics<parallel>], iteration_bounds = array<i64: 1>, scalar_prefetch = 0 : i64, scratch_operands = 0 : i64, tpu.core_type = #tpu.core_type<tc>, window_params = [{transform_indices = @transform_0, window_bounds = array<i64: 8, 16>}, {pipeline_mode = #tpu.pipeline_mode<synchronous>, transform_indices = @transform_1, window_bounds = array<i64: 16, 128>}, {pipeline_mode = #tpu.pipeline_mode<synchronous>, transform_indices = @transform_2, window_bounds = array<i64: 1, 128>}, {pipeline_mode = #tpu.pipeline_mode<synchronous>, transform_indices = @transform_3, window_bounds = array<i64: 128, 128>}, {pipeline_mode = #tpu.pipeline_mode<synchronous>, transform_indices = @transform_4, window_bounds = array<i64: 1, 128>}, {pipeline_mode = #tpu.pipeline_mode<synchronous>, transform_indices = @transform_5, window_bounds = array<i64: 128, 4>}, {pipeline_mode = #tpu.pipeline_mode<synchronous>, transform_indices = @transform_6, window_bounds = array<i64: 1, 4>}, {transform_indices = @transform_7, window_bounds = array<i64: 8, 4>}]} {
    %c0 = arith.constant 0 : index
    %c0_0 = arith.constant 0 : index
    %0 = vector.load %arg1[%c0, %c0_0] : memref<8x16xf32, #tpu.memory_space<vmem>>, vector<8x16xf32>
    %1 = arith.truncf %0 : vector<8x16xf32> to vector<8x16xbf16>
    %c0_1 = arith.constant 0 : index
    %c0_2 = arith.constant 0 : index
    %2 = vector.load %arg2[%c0_1, %c0_2] : memref<16x128xbf16, #tpu.memory_space<vmem>>, vector<16x128xbf16>
    %cst = arith.constant dense<0.000000e+00> : vector<8x128xf32>
    %3 = tpu.matmul %1, %2, %cst {dimension_numbers = #tpu.dot_dimension_numbers<[1], [0], [0], [1], [0, 0, 1, 1], [], []>} : vector<8x16xbf16>, vector<16x128xbf16>, vector<8x128xf32> -> vector<8x128xf32>
    %c0_3 = arith.constant 0 : index
    %c0_4 = arith.constant 0 : index
    %4 = vector.load %arg3[%c0_3, %c0_4] : memref<1x128xf32, #tpu.memory_space<vmem>>, vector<1x128xf32>
    %5 = vector.broadcast %4 : vector<1x128xf32> to vector<8x128xf32>
    %6 = arith.addf %3, %5 : vector<8x128xf32>
    %cst_5 = arith.constant 0.000000e+00 : f32
    %7 = vector.broadcast %cst_5 : f32 to vector<8x128xf32>
    %8 = arith.maximumf %6, %7 : vector<8x128xf32>
    %9 = arith.truncf %8 : vector<8x128xf32> to vector<8x128xbf16>
    %c0_6 = arith.constant 0 : index
    %c0_7 = arith.constant 0 : index
    %10 = vector.load %arg4[%c0_6, %c0_7] : memref<128x128xbf16, #tpu.memory_space<vmem>>, vector<128x128xbf16>
    %cst_8 = arith.constant dense<0.000000e+00> : vector<8x128xf32>
    %11 = tpu.matmul %9, %10, %cst_8 {dimension_numbers = #tpu.dot_dimension_numbers<[1], [0], [0], [1], [0, 0, 1, 1], [], []>} : vector<8x128xbf16>, vector<128x128xbf16>, vector<8x128xf32> -> vector<8x128xf32>
    %c0_9 = arith.constant 0 : index
    %c0_10 = arith.constant 0 : index
    %12 = vector.load %arg5[%c0_9, %c0_10] : memref<1x128xf32, #tpu.memory_space<vmem>>, vector<1x128xf32>
    %13 = vector.broadcast %12 : vector<1x128xf32> to vector<8x128xf32>
    %14 = arith.addf %11, %13 : vector<8x128xf32>
    %cst_11 = arith.constant 0.000000e+00 : f32
    %15 = vector.broadcast %cst_11 : f32 to vector<8x128xf32>
    %16 = arith.maximumf %14, %15 : vector<8x128xf32>
    %17 = arith.truncf %16 : vector<8x128xf32> to vector<8x128xbf16>
    %c0_12 = arith.constant 0 : index
    %c0_13 = arith.constant 0 : index
    %18 = vector.load %arg6[%c0_12, %c0_13] : memref<128x4xbf16, #tpu.memory_space<vmem>>, vector<128x4xbf16>
    %cst_14 = arith.constant dense<0.000000e+00> : vector<8x4xf32>
    %19 = tpu.matmul %17, %18, %cst_14 {dimension_numbers = #tpu.dot_dimension_numbers<[1], [0], [0], [1], [0, 0, 1, 1], [], []>} : vector<8x128xbf16>, vector<128x4xbf16>, vector<8x4xf32> -> vector<8x4xf32>
    %c0_15 = arith.constant 0 : index
    %c0_16 = arith.constant 0 : index
    %20 = vector.load %arg7[%c0_15, %c0_16] : memref<1x4xf32, #tpu.memory_space<vmem>>, vector<1x4xf32>
    %21 = vector.broadcast %20 : vector<1x4xf32> to vector<8x4xf32>
    %22 = arith.addf %19, %21 : vector<8x4xf32>
    %c0_17 = arith.constant 0 : index
    %c0_18 = arith.constant 0 : index
    %23 = vector.load %arg8[%c0_17, %c0_18] : memref<8x4xf32, #tpu.memory_space<vmem>>, vector<8x4xf32>
    tpu.vector_store %arg8[%c0_17, %c0_18], %22 {strides = array<i32>} : memref<8x4xf32, #tpu.memory_space<vmem>>, vector<8x4xf32>,
    return
  }
  func.func @transform_0(%arg0: i32) -> (i32, i32) {
    %c0_i32 = arith.constant 0 : i32
    %c0_i32_0 = arith.constant 0 : i32
    return %arg0, %c0_i32 : i32, i32
  }
  func.func @transform_1(%arg0: i32) -> (i32, i32) {
    %c0_i32 = arith.constant 0 : i32
    %c0_i32_0 = arith.constant 0 : i32
    %c0_i32_1 = arith.constant 0 : i32
    return %c0_i32, %c0_i32_0 : i32, i32
  }
  func.func @transform_2(%arg0: i32) -> (i32, i32) {
    %c0_i32 = arith.constant 0 : i32
    %c0_i32_0 = arith.constant 0 : i32
    %c0_i32_1 = arith.constant 0 : i32
    return %c0_i32, %c0_i32_0 : i32, i32
  }
  func.func @transform_3(%arg0: i32) -> (i32, i32) {
    %c0_i32 = arith.constant 0 : i32
    %c0_i32_0 = arith.constant 0 : i32
    %c0_i32_1 = arith.constant 0 : i32
    return %c0_i32, %c0_i32_0 : i32, i32
  }
  func.func @transform_4(%arg0: i32) -> (i32, i32) {
    %c0_i32 = arith.constant 0 : i32
    %c0_i32_0 = arith.constant 0 : i32
    %c0_i32_1 = arith.constant 0 : i32
    return %c0_i32, %c0_i32_0 : i32, i32
  }
  func.func @transform_5(%arg0: i32) -> (i32, i32) {
    %c0_i32 = arith.constant 0 : i32
    %c0_i32_0 = arith.constant 0 : i32
    %c0_i32_1 = arith.constant 0 : i32
    return %c0_i32, %c0_i32_0 : i32, i32
  }
  func.func @transform_6(%arg0: i32) -> (i32, i32) {
    %c0_i32 = arith.constant 0 : i32
    %c0_i32_0 = arith.constant 0 : i32
    %c0_i32_1 = arith.constant 0 : i32
    return %c0_i32, %c0_i32_0 : i32, i32
  }
  func.func @transform_7(%arg0: i32) -> (i32, i32) {
    %c0_i32 = arith.constant 0 : i32
    %c0_i32_0 = arith.constant 0 : i32
    return %arg0, %c0_i32 : i32, i32
  }
}

</mosaic_0001>

<bundles_post_ra>
// kernel: net_forward.1
= control target key start
LH: loop header
LB: loop body
LE: loop exit
PB: predicated region body
PF: predicated region fallthrough
CT: control target
= control target key end

     0   :  { %12 = vsyncpa [#allocation3], 0  ;;  %s634_s0 = inlined_call_operand.vmem [shape: f32[8,16], index: 0, kind: input, shape index: {}]   ;;  %s635_s1 = inlined_call_operand.hbm [shape: bf16[16,128], index: 1, kind: input, shape index: {}]   ;;  %s636_s2 = inlined_call_operand.vmem [shape: f32[1,128], index: 2, kind: input, shape index: {}]   ;;  %s637_s3 = inlined_call_operand.vmem [shape: bf16[128,128], index: 3, kind: input, shape index: {}]   ;;  %s638_s4 = inlined_call_operand.vmem [shape: f32[1,128], index: 4, kind: input, shape index: {}]   ;;  %s639_s5 = inlined_call_operand.vmem [shape: bf16[128,4], index: 5, kind: input, shape index: {}]   ;;  %s640_s6 = inlined_call_operand.hbm [shape: f32[1,4], index: 6, kind: input, shape index: {}]   ;;  %s641_s7 = inlined_call_operand.vmem [shape: f32[8,4], index: 7, kind: output, shape index: {}]  }
   0x1   :  { %13 = vsyncpa [#allocation5], 0  ;;  %s502_s24 = smov [#allocation2]  }
   0x2   :  { %s21_s25 = sshll.u32 %s502_s24, 4  ;;  %s22_s25 = int_to_ptr.vmem [resolvable:$true] %s21_s25 }
   0x3   :  { %s466_s26 = scalar_lea.vmem %s22_s25, 128  ;;  %p471_p1 = scmp.lt.s32.totalorder %s22_s25, %s22_s25 }
   0x4   :  { %p467_p0 = scmp.ne.s32.totalorder %s22_s25, %s466_s26  ;;  %p472_p2 = scmp.lt.s32.totalorder %s466_s26, %s466_s26 }
   0x6   :  { %p473_p3 = por %p472_p2, %p471_p1 }
   0x8   :  { %p474_p4 = pnand %p473_p3, %p467_p0 }
   0xa   :  { %477 = shalt.err (!%p474_p4)
}
   0xb   :  { %s503_s27 = smov 64   ;;  %s504_s28 = smov 4  }
   0xc   :  { %27 = dma.hbm_to_vmem [thread:$0]  %s635_s1, 128, %s22_s25, [#allocation3], %s503_s27, %s503_s27, %s504_s28  }
   0xd   :  { %s505_s8 = smov [#allocation4]  }
   0xe   :  { %s42_s9 = sshll.u32 %s505_s8, 4  ;;  %s43_s9 = int_to_ptr.vmem [resolvable:$true] %s42_s9 }
   0xf   :  { %s486_s10 = scalar_lea.vmem %s43_s9, 16  ;;  %s490_s11 = scalar_lea.vmem %s43_s9, 32 }
  0x10   :  { %p487_p5 = scmp.ne.s32.totalorder %s43_s9, %s486_s10  ;;  %p491_p6 = scmp.lt.s32.totalorder %s43_s9, %s43_s9 }
  0x11   :  { %p492_p7 = scmp.lt.s32.totalorder %s490_s11, %s486_s10 }
  0x13   :  { %p493_p8 = por %p492_p7, %p491_p6 }
  0x15   :  { %p494_p9 = pnand %p493_p8, %p487_p5 }
  0x17   :  { %497 = shalt.err (!%p494_p9)
}
  0x18   :  { %45 = dma.hbm_to_vmem [thread:$0]  %s640_s6, 16, %s43_s9, [#allocation5]  }
  0x19   :  { %498 = dma.done.wait [#allocation3], 128  }
  0x1a   :  { %499 = vsyncadd [#allocation3], 4294967168 }
  0x1b   :  { %500 = dma.done.wait [#allocation5], 16  }
  0x1c   :  { %501 = vsyncadd [#allocation5], 4294967280  ;;  %v506_v0 = vmov 0.0   ;;  %vm507_vm0 = vmmov 0   ;;  %v441_v1 = vld [vmem:[#allocation2] sm:$0xff]   ;;  %vm70_vm1 = vcmask 130048  }
  0x1d   :  { %389 = vmatprep.subr.bf16.mxu0 %v506_v0  ;;  %391 = vmatprep.mubr.msk.bf16.mxu0 %vm507_vm0, %v506_v0  ;;  %v53_v2 = vld [vmem:[%s634_s0] sm:$0xff]  ;;  %v442_v4 = vld [vmem:[%s637_s3 + $0x38] sm:$0xff]   ;;  %v443_v5 = vld [vmem:[%s637_s3 + $0x30] sm:$0xff]   ;;  %vm340_vm2 = vcmask 31744  }
  0x1e   :  { %395 = vmatprep.subr.bf16.mxu1 %v506_v0  ;;  %411 = vmatprep.mubr.msk.bf16.mxu1 %vm507_vm0, %v506_v0  ;;  %v54_v3 = vpack.c.bf16 %v53_v2, %v53_v2  ;;  %v444_v6 = vld [vmem:[%s637_s3 + $0x28] sm:$0xff]   ;;  %v445_v7 = vld [vmem:[%s637_s3 + $0x20] sm:$0xff]   ;;  %v446_v8 = vld [vmem:[%s637_s3 + $0x18] sm:$0xff]  }
  0x1f   :  { %390 = vmatpush3.bf16.msra.mxu0 %v441_v1  ;;  %396 = vmatpush3.bf16.msra.mxu1 %v442_v4  ;;  %v447_v9 = vld [vmem:[%s637_s3 + $0x10] sm:$0xff]   ;;  %v448_v10 = vld [vmem:[%s637_s3 + $0x8] sm:$0xff]   ;;  %v449_v11 = vld [vmem:[%s637_s3] sm:$0xff]  }
  0x20   :  { %415 = vmatprep.subr.bf16.mxu0 %v506_v0  ;;  %397 = vmatprep.subr.bf16.mxu1 %v506_v0  ;;  %v450_v12 = vld [vmem:[%s639_s5 + $0x38] sm:$0xff]   ;;  %v451_v13 = vld [vmem:[%s639_s5 + $0x30] sm:$0xff]   ;;  %v452_v14 = vld [vmem:[%s639_s5 + $0x28] sm:$0xff]  }
  0x21   :  { %v453_v15 = vld [vmem:[%s639_s5 + $0x20] sm:$0xff]   ;;  %v454_v16 = vld [vmem:[%s639_s5 + $0x18] sm:$0xff]   ;;  %v455_v17 = vld [vmem:[%s639_s5 + $0x10] sm:$0xff]  }
  0x22   :  { %392 = vmatmul.mubr.msk.bf16.vlgmr.msra.gmra.mxu0 %vm70_vm1, %v54_v3  ;;  %v348_v18 = vld [vmem:[%s636_s2] ss:$0 sm:$0xff]  ;;  %v456_v26 = vld [vmem:[%s639_s5 + $0x8] sm:$0xff]  }
  0x23   :  { %431 = vmatprep.mubr.msk.bf16.mxu0 %vm507_vm0, %v506_v0  ;;  %398 = vmatpush3.bf16.msra.mxu1 %v443_v5  ;;  %v457_v27 = vld [vmem:[%s639_s5] sm:$0xff]   ;;  %v360_v36 = vld [vmem:[#allocation4] ss:$0 sm:$0xff] }
  0x24   :  { %399 = vmatprep.subr.bf16.mxu1 %v506_v0  ;;  %416 = vmatpush3.bf16.msra.mxu0 %v450_v12  ;;  %v351_v28 = vld [vmem:[%s638_s4] ss:$0 sm:$0xff] }
  0x25   :  { %417 = vmatprep.subr.bf16.mxu0 %v506_v0 }
  0x27   :  { %400 = vmatpush3.bf16.msra.mxu1 %v444_v6 }
  0x28   :  { %401 = vmatprep.subr.bf16.mxu1 %v506_v0  ;;  %418 = vmatpush3.bf16.msra.mxu0 %v451_v13 }
  0x29   :  { %419 = vmatprep.subr.bf16.mxu0 %v506_v0 }
  0x2b   :  { %402 = vmatpush3.bf16.msra.mxu1 %v445_v7 }
  0x2c   :  { %403 = vmatprep.subr.bf16.mxu1 %v506_v0  ;;  %420 = vmatpush3.bf16.msra.mxu0 %v452_v14 }
  0x2d   :  { %421 = vmatprep.subr.bf16.mxu0 %v506_v0 }
  0x2f   :  { %404 = vmatpush3.bf16.msra.mxu1 %v446_v8 }
  0x30   :  { %405 = vmatprep.subr.bf16.mxu1 %v506_v0  ;;  %422 = vmatpush3.bf16.msra.mxu0 %v453_v15 }
  0x31   :  { %423 = vmatprep.subr.bf16.mxu0 %v506_v0 }
  0x33   :  { %406 = vmatpush3.bf16.msra.mxu1 %v447_v9 }
  0x34   :  { %407 = vmatprep.subr.bf16.mxu1 %v506_v0  ;;  %424 = vmatpush3.bf16.msra.mxu0 %v454_v16 }
  0x35   :  { %425 = vmatprep.subr.bf16.mxu0 %v506_v0 }
  0x37   :  { %408 = vmatpush3.bf16.msra.mxu1 %v448_v10 }
  0x38   :  { %409 = vmatprep.subr.bf16.mxu1 %v506_v0  ;;  %426 = vmatpush3.bf16.msra.mxu0 %v455_v17 }
  0x39   :  { %427 = vmatprep.subr.bf16.mxu0 %v506_v0 }
  0x3b   :  { %410 = vmatpush3.bf16.msra.mxu1 %v449_v11 }
  0x3c   :  { %428 = vmatpush3.bf16.msra.mxu0 %v456_v26 }
  0x3d   :  { %429 = vmatprep.subr.bf16.mxu0 %v506_v0 }
  0x40   :  { %430 = vmatpush3.bf16.msra.mxu0 %v457_v27 }
  0xe2   :  { %v108_v19 = vpop.f32.mrf.mxu0 }
  0xe3   :  { %v109_v20 = vadd.f32 %v348_v18, %v108_v19 }
  0xe4   :  { %v393_v21 = vpop.f32.mrf.mxu0 }
  0xe5   :  { %v114_v22 = vmax.f32 %v109_v20, 0.0 }
  0xe6   :  { %v111_v23 = vpop.f32.mrf.mxu0 }
  0xe7   :  { %v115_v24 = vpack.c.bf16 %v114_v22, %v114_v22 }
  0xe8   :  { %v394_v25 = vpop.f32.mrf.mxu0 }
  0xe9   :  { %412 = vmatmul.mubr.bf16.vlgmr.msra.gmra.mxu1 %v115_v24 }
 0x1a9   :  { %v221_v29 = vpop.f32.mrf.mxu1 }
 0x1aa   :  { %v222_v30 = vadd.f32 %v351_v28, %v221_v29 }
 0x1ab   :  { %v413_v31 = vpop.f32.mrf.mxu1 }
 0x1ac   :  { %v227_v32 = vmax.f32 %v222_v30, 0.0 }
 0x1ad   :  { %v224_v33 = vpop.f32.mrf.mxu1 }
 0x1ae   :  { %v228_v34 = vpack.c.bf16 %v227_v32, %v227_v32 }
 0x1af   :  { %v414_v35 = vpop.f32.mrf.mxu1 }
 0x1b0   :  { %432 = vmatmul.mubr.bf16.vlgmr.msra.gmra.mxu0 %v228_v34 }
 0x270   :  { %v334_v37 = vpop.f32.mrf.mxu0 }
 0x271   :  { %v335_v38 = vadd.f32 %v360_v36, %v334_v37 }
 0x272   :  { %v433_v39 = vpop.f32.mrf.mxu0 }
 0x273   :  { %341 = vst.msk [vmem:[%s641_s7] sm:$0xff] %vm340_vm2, %v335_v38 }
 0x274   :  { %v337_v40 = vpop.f32.mrf.mxu0 }
 0x276   :  { %v434_v41 = vpop.f32.mrf.mxu0 }
 0x277   :  { %346 = vsyncpa [#allocation3], 1 }
 0x278   :  { %347 = vsyncpa [#allocation5], 1 }

</bundles_post_ra>
